<compile_context>
chip_gen: v5e
topology: v5e:2x2
jax: 0.10.0
libtpu: 0.0.40
codegen_flags: <defaults>
</compile_context>

<pallas_src>
import functools

import jax
import jax.numpy as jnp
from jax.experimental import pallas as pl
from jax.experimental.pallas import tpu as pltpu


def _conv_bn_lrelu_kernel(p_ref, w_ref, b_ref, o_ref, acc_ref, *,
                          negative_slope, apply_relu):
    # p_ref:  (tk, tn)    im2col patches (lane axis = batch*spatial)
    # w_ref:  (C_out, tk) BN-scale-folded conv weights
    # b_ref:  (C_out, 1)  BN-folded bias
    # o_ref:  (C_out, tn)
    # acc_ref:(C_out, tn) f32 accumulator across the K grid axis
    k = pl.program_id(1)

    @pl.when(k == 0)
    def _():
        acc_ref[...] = jnp.zeros_like(acc_ref)

    acc_ref[...] += jnp.dot(w_ref[...], p_ref[...],
                            preferred_element_type=jnp.float32)   # MXU

    @pl.when(k == pl.num_programs(1) - 1)
    def _():
        y = acc_ref[...] + b_ref[...]                             # bias over lanes
        if apply_relu:
            y = jnp.where(y >= 0, y, negative_slope * y)          # LeakyReLU(0.01)
        o_ref[...] = y.astype(o_ref.dtype)


def _round_up(x, m):
    return ((x + m - 1) // m) * m


def _plan_tiles(N, K, *, max_tn=1024, max_tk=512):
    """Pick lane-tile (tn) and reduction-tile (tk) plus padded extents.

    tn is a multiple of 128 (or the full extent), tk a multiple of 128 when tiled
    (weight block's last dim) — satisfies the (8,128) BlockSpec constraint and keeps
    double-buffered blocks well under the default scoped-VMEM limit on v5e/v6e/v7x.
    """
    if N <= max_tn:
        tn, n_pad = N, N
    else:
        tn, n_pad = max_tn, _round_up(N, max_tn)
    if K <= max_tk:
        tk, k_pad = K, K
    else:
        tk, k_pad = max_tk, _round_up(K, max_tk)
    return tn, n_pad, tk, k_pad


def basic_conv2d_forward(x, weight, gamma, beta, running_mean, running_var,
                         *, stride=1, padding=0, dilation=1, eps=1e-5,
                         relu=True, negative_slope=0.01):
    """x: (B, C_in, H, W) NCHW.  weight: (C_out, C_in, kh, kw) (PyTorch layout)."""
    B, C_in, H, W = x.shape
    C_out, C_in_w, kh, kw = weight.shape
    assert C_in == C_in_w
    H_out = (H + 2 * padding - dilation * (kh - 1) - 1) // stride + 1
    W_out = (W + 2 * padding - dilation * (kw - 1) - 1) // stride + 1
    HW = H_out * W_out
    N = B * HW                    # lane axis of the GEMM
    K = C_in * kh * kw            # reduction axis of the GEMM

    # ---- im2col: layout plumbing done once on the host side (XLA) ----
    xp = jnp.pad(x, ((0, 0), (0, 0), (padding, padding), (padding, padding)))
    taps = []
    for i in range(kh):
        for j in range(kw):
            h0, w0 = i * dilation, j * dilation
            taps.append(jax.lax.slice(
                xp, (0, 0, h0, w0),
                (B, C_in, h0 + (H_out - 1) * stride + 1,
                 w0 + (W_out - 1) * stride + 1),
                (1, 1, stride, stride)))                          # (B, C_in, Ho, Wo)
    t = jnp.stack(taps, axis=0)                                   # (kh*kw, B, C_in, Ho, Wo)
    # K ordering (C_in, kh, kw) matches weight.reshape(C_out, C_in*kh*kw);
    # columns ordered (B, Ho, Wo).
    patches = t.transpose(2, 0, 1, 3, 4).reshape(K, N).astype(jnp.float32)

    # ---- fold eval-mode BatchNorm into the GEMM operands ----
    scale = gamma / jnp.sqrt(running_var + eps)                   # (C_out,)
    w_fold = weight.reshape(C_out, K).astype(jnp.float32) * scale[:, None]
    b_fold = (beta - running_mean * scale).reshape(C_out, 1).astype(jnp.float32)

    tn, n_pad, tk, k_pad = _plan_tiles(N, K)
    if (k_pad != K) or (n_pad != N):
        patches = jnp.pad(patches, ((0, k_pad - K), (0, n_pad - N)))
    if k_pad != K:
        w_fold = jnp.pad(w_fold, ((0, 0), (0, k_pad - K)))

    n_n = n_pad // tn
    n_k = k_pad // tk

    kernel = functools.partial(_conv_bn_lrelu_kernel,
                               negative_slope=negative_slope,
                               apply_relu=relu)

    out2d = pl.pallas_call(
        kernel,
        out_shape=jax.ShapeDtypeStruct((C_out, n_pad), x.dtype),
        grid_spec=pltpu.PrefetchScalarGridSpec(
            num_scalar_prefetch=0,
            grid=(n_n, n_k),                                      # reduction axis last
            in_specs=[
                pl.BlockSpec((tk, tn), lambda n, k: (k, n)),      # patches
                pl.BlockSpec((C_out, tk), lambda n, k: (0, k)),   # folded weights
                pl.BlockSpec((C_out, 1), lambda n, k: (0, 0)),    # folded bias
            ],
            out_specs=pl.BlockSpec((C_out, tn), lambda n, k: (0, n)),
            scratch_shapes=[pltpu.VMEM((C_out, tn), jnp.float32)],
        ),
        compiler_params=pltpu.CompilerParams(
            dimension_semantics=("parallel", "arbitrary")),
        cost_estimate=pl.CostEstimate(
            flops=2 * C_out * k_pad * n_pad,
            transcendentals=0,
            bytes_accessed=4 * (k_pad * n_pad + C_out * k_pad + C_out * n_pad)),
    )(patches, w_fold, b_fold)

    out = out2d[:, :N].reshape(C_out, B, H_out, W_out).transpose(1, 0, 2, 3)
    return out


def _reference(x, weight, gamma, beta, running_mean, running_var,
               *, stride, padding, dilation, eps, relu, negative_slope):
    y = jax.lax.conv_general_dilated(
        x, weight, window_strides=(stride, stride),
        padding=[(padding, padding), (padding, padding)],
        rhs_dilation=(dilation, dilation),
        dimension_numbers=("NCHW", "OIHW", "NCHW"))
    scale = gamma / jnp.sqrt(running_var + eps)
    bias = beta - running_mean * scale
    y = y * scale[None, :, None, None] + bias[None, :, None, None]
    if relu:
        y = jnp.where(y >= 0, y, negative_slope * y)
    return y


if __name__ == "__main__":
    key = jax.random.PRNGKey(0)
    k_x, k_w, k_g, k_b, k_m, k_v = jax.random.split(key, 6)

    # Small shapes consistent with the module.
    B, C_in, H, W = 2, 4, 16, 16
    C_out, ksz, stride, padding, dilation = 8, 3, 1, 1, 1

    x = jax.random.normal(k_x, (B, C_in, H, W), dtype=jnp.float32)
    fan_in = C_in * ksz * ksz
    lim = 1.0 / (fan_in ** 0.5)
    weight = jax.random.uniform(k_w, (C_out, C_in, ksz, ksz), jnp.float32, -lim, lim)
    gamma = 1.0 + 0.1 * jax.random.normal(k_g, (C_out,), dtype=jnp.float32)
    beta = 0.1 * jax.random.normal(k_b, (C_out,), dtype=jnp.float32)
    running_mean = 0.1 * jax.random.normal(k_m, (C_out,), dtype=jnp.float32)
    running_var = jax.random.uniform(k_v, (C_out,), jnp.float32, 0.5, 1.5)

    out = basic_conv2d_forward(
        x, weight, gamma, beta, running_mean, running_var,
        stride=stride, padding=padding, dilation=dilation, relu=True)
    out = jax.block_until_ready(out)

    ref = _reference(x, weight, gamma, beta, running_mean, running_var,
                     stride=stride, padding=padding, dilation=dilation,
                     eps=1e-5, relu=True, negative_slope=0.01)

    assert out.shape == (B, C_out, H, W)
    assert jnp.allclose(out, ref, atol=1e-4, rtol=1e-4), "mismatch vs reference"

    print("KERNEL_OK")
</pallas_src>

<mosaic_0001>
module attributes {stable_mosaic.version = 11 : i64} {
  func.func @_conv_bn_lrelu_kernel(%arg0: i32, %arg1: i32, %arg2: memref<36x512xf32, #tpu.memory_space<vmem>>, %arg3: memref<8x36xf32, #tpu.memory_space<vmem>>, %arg4: memref<8x1xf32, #tpu.memory_space<vmem>>, %arg5: memref<8x512xf32, #tpu.memory_space<vmem>>, %arg6: memref<8x512xf32, #tpu.memory_space<vmem>>) attributes {dimension_semantics = [#tpu.dimension_semantics<parallel>, #tpu.dimension_semantics<arbitrary>], iteration_bounds = array<i64: 1, 1>, scalar_prefetch = 0 : i64, scratch_operands = 1 : i64, tpu.core_type = #tpu.core_type<tc>, window_params = [{transform_indices = @transform_0, window_bounds = array<i64: 36, 512>}, {transform_indices = @transform_1, window_bounds = array<i64: 8, 36>}, {pipeline_mode = #tpu.pipeline_mode<synchronous>, transform_indices = @transform_2, window_bounds = array<i64: 8, 1>}, {transform_indices = @transform_3, window_bounds = array<i64: 8, 512>}]} {
    %c0_i32 = arith.constant 0 : i32
    %0 = arith.cmpi eq, %arg1, %c0_i32 : i32
    %1 = arith.extui %0 : i1 to i32
    %c0_i32_0 = arith.constant 0 : i32
    %2 = arith.cmpi ne, %1, %c0_i32_0 : i32
    scf.if %2 {
      %cst_10 = arith.constant 0.000000e+00 : f32
      %12 = vector.broadcast %cst_10 : f32 to vector<8x512xf32>
      %c0_11 = arith.constant 0 : index
      %c0_12 = arith.constant 0 : index
      %13 = vector.load %arg6[%c0_11, %c0_12] : memref<8x512xf32, #tpu.memory_space<vmem>>, vector<8x512xf32>
      tpu.vector_store %arg6[%c0_11, %c0_12], %12 {strides = array<i32>} : memref<8x512xf32, #tpu.memory_space<vmem>>, vector<8x512xf32>,
    } else {
    }
    %c0 = arith.constant 0 : index
    %c0_1 = arith.constant 0 : index
    %3 = vector.load %arg6[%c0, %c0_1] : memref<8x512xf32, #tpu.memory_space<vmem>>, vector<8x512xf32>
    %c0_2 = arith.constant 0 : index
    %c0_3 = arith.constant 0 : index
    %4 = vector.load %arg3[%c0_2, %c0_3] : memref<8x36xf32, #tpu.memory_space<vmem>>, vector<8x36xf32>
    %c0_4 = arith.constant 0 : index
    %c0_5 = arith.constant 0 : index
    %5 = vector.load %arg2[%c0_4, %c0_5] : memref<36x512xf32, #tpu.memory_space<vmem>>, vector<36x512xf32>
    %cst = arith.constant dense<0.000000e+00> : vector<8x512xf32>
    %6 = tpu.matmul %4, %5, %cst {dimension_numbers = #tpu.dot_dimension_numbers<[1], [0], [0], [1], [0, 0, 1, 1], [], []>} : vector<8x36xf32>, vector<36x512xf32>, vector<8x512xf32> -> vector<8x512xf32>
    %7 = arith.addf %3, %6 : vector<8x512xf32>
    %c0_6 = arith.constant 0 : index
    %c0_7 = arith.constant 0 : index
    %8 = vector.load %arg6[%c0_6, %c0_7] : memref<8x512xf32, #tpu.memory_space<vmem>>, vector<8x512xf32>
    tpu.vector_store %arg6[%c0_6, %c0_7], %7 {strides = array<i32>} : memref<8x512xf32, #tpu.memory_space<vmem>>, vector<8x512xf32>,
    %c0_i32_8 = arith.constant 0 : i32
    %9 = arith.cmpi eq, %arg1, %c0_i32_8 : i32
    %10 = arith.extui %9 : i1 to i32
    %c0_i32_9 = arith.constant 0 : i32
    %11 = arith.cmpi ne, %10, %c0_i32_9 : i32
    scf.if %11 {
      %c0_10 = arith.constant 0 : index
      %c0_11 = arith.constant 0 : index
      %12 = vector.load %arg6[%c0_10, %c0_11] : memref<8x512xf32, #tpu.memory_space<vmem>>, vector<8x512xf32>
      %c0_12 = arith.constant 0 : index
      %c0_13 = arith.constant 0 : index
      %13 = vector.load %arg4[%c0_12, %c0_13] : memref<8x1xf32, #tpu.memory_space<vmem>>, vector<8x1xf32>
      %14 = vector.broadcast %13 : vector<8x1xf32> to vector<8x512xf32>
      %15 = arith.addf %12, %14 : vector<8x512xf32>
      %cst_14 = arith.constant 0.000000e+00 : f32
      %16 = vector.broadcast %cst_14 : f32 to vector<8x512xf32>
      %17 = arith.cmpf oge, %15, %16 : vector<8x512xf32>
      %cst_15 = arith.constant 0.00999999977 : f32
      %18 = vector.broadcast %cst_15 : f32 to vector<8x512xf32>
      %19 = arith.mulf %18, %15 : vector<8x512xf32>
      %20 = arith.select %17, %15, %19 : vector<8x512xi1>, vector<8x512xf32>
      %c0_16 = arith.constant 0 : index
      %c0_17 = arith.constant 0 : index
      %21 = vector.load %arg5[%c0_16, %c0_17] : memref<8x512xf32, #tpu.memory_space<vmem>>, vector<8x512xf32>
      tpu.vector_store %arg5[%c0_16, %c0_17], %20 {strides = array<i32>} : memref<8x512xf32, #tpu.memory_space<vmem>>, vector<8x512xf32>,
    } else {
    }
    return
  }
  func.func @transform_0(%arg0: i32, %arg1: i32) -> (i32, i32) {
    %c0_i32 = arith.constant 0 : i32
    return %arg1, %arg0 : i32, i32
  }
  func.func @transform_1(%arg0: i32, %arg1: i32) -> (i32, i32) {
    %c0_i32 = arith.constant 0 : i32
    %c0_i32_0 = arith.constant 0 : i32
    return %c0_i32, %arg1 : i32, i32
  }
  func.func @transform_2(%arg0: i32, %arg1: i32) -> (i32, i32) {
    %c0_i32 = arith.constant 0 : i32
    %c0_i32_0 = arith.constant 0 : i32
    %c0_i32_1 = arith.constant 0 : i32
    return %c0_i32, %c0_i32_0 : i32, i32
  }
  func.func @transform_3(%arg0: i32, %arg1: i32) -> (i32, i32) {
    %c0_i32 = arith.constant 0 : i32
    %c0_i32_0 = arith.constant 0 : i32
    return %c0_i32, %arg0 : i32, i32
  }
}

</mosaic_0001>

<bundles_post_ra>
// kernel: tpu_custom_call.1
= control target key start
LH: loop header
LB: loop body
LE: loop exit
PB: predicated region body
PF: predicated region fallthrough
CT: control target
= control target key end

     0   :  { %8 = vsyncpa [#allocation4], 0  ;;  %s322_s0 = inlined_call_operand.hbm [shape: f32[36,512], index: 0, kind: input, shape index: {}]   ;;  %s323_s1 = inlined_call_operand.vmem [shape: f32[8,36], index: 1, kind: input, shape index: {}]   ;;  %s324_s2 = inlined_call_operand.vmem [shape: f32[8,1], index: 2, kind: input, shape index: {}]   ;;  %s325_s3 = inlined_call_operand.hbm [shape: f32[8,512], index: 3, kind: output, shape index: {}]  }
   0x1   :  { %9 = vsyncpa [#allocation5], 0  ;;  %s14_s14 = sshll.u32 %s322_s0, 4  ;;  %s285_s15 = smov [#allocation3]   ;;  %s15_s14 = int_to_ptr.hbm [resolvable:$true] %s14_s14 }
   0x2   :  { %s16_s16 = sshll.u32 %s285_s15, 4  ;;  %s286_s17 = smov 512   ;;  %s17_s16 = int_to_ptr.vmem [resolvable:$true] %s16_s16 }
   0x3   :  { %s287_s18 = smov 32  }
   0x4   :  { %22 = dma.hbm_to_vmem [thread:$0]  %s15_s14, 2560, %s17_s16, [#allocation4], %s286_s17, %s286_s17, %s287_s18  }
   0x5   :  { %281 = dma.done.wait [#allocation4], 2560  }
   0x6   :  { %282 = vsyncadd [#allocation4], 4294964736  ;;  %v288_v0 = vmov 0   ;;  %vm68_vm0 = vcmask 1043456   ;;  %v62_v1 = vld [vmem:[#allocation3 + $0x90] sm:$0xf] }
   0x7   :  { %232 = vset.pattern.permute.xlu0 %v288_v0  ;;  %v63_v2 = vld [vmem:[#allocation3 + $0x98] sm:$0xf]  ;;  %v58_v3 = vld [vmem:[#allocation3 + $0x70] sm:$0xff]  ;;  %223 = vmatpush.msk.msra.mxu2 %vm68_vm0, %v62_v1  ;;  %v60_v5 = vld [vmem:[#allocation3 + $0x80] sm:$0xf]  ;;  %vm64_vm1 = vcmask 293888  }
   0x8   :  { %225 = vmatpush.msk.msra.mxu3 %vm68_vm0, %v63_v2  ;;  %v59_v4 = vld [vmem:[#allocation3 + $0x78] sm:$0xff]  ;;  %v61_v6 = vld [vmem:[#allocation3 + $0x88] sm:$0xf]  ;;  %219 = vmatpush.msk.msra.mxu0 %vm68_vm0, %v60_v5  ;;  %v54_v7 = vld [vmem:[#allocation3 + $0x50] sm:$0xff]  ;;  %s209_s24 = sshll.u32 %s325_s3, 4  ;;  %s210_s24 = int_to_ptr.hbm [resolvable:$true] %s209_s24 }
   0x9   :  { %221 = vmatpush.msk.msra.mxu1 %vm68_vm0, %v61_v6  ;;  %v55_v8 = vld [vmem:[#allocation3 + $0x58] sm:$0xff]  ;;  %v56_v9 = vld [vmem:[#allocation3 + $0x60] sm:$0xff]  ;;  %133 = vmatpush.msra.mxu2 %v58_v3  ;;  %v57_v10 = vld [vmem:[#allocation3 + $0x68] sm:$0xff] }
   0xa   :  { %153 = vmatpush.msra.mxu3 %v59_v4  ;;  %v50_v11 = vld [vmem:[#allocation3 + $0x30] sm:$0xff]  ;;  %93 = vmatpush.msra.mxu0 %v56_v9  ;;  %v51_v12 = vld [vmem:[#allocation3 + $0x38] sm:$0xff]  ;;  %v52_v13 = vld [vmem:[#allocation3 + $0x40] sm:$0xff] }
   0xb   :  { %113 = vmatpush.msra.mxu1 %v57_v10  ;;  %v53_v14 = vld [vmem:[#allocation3 + $0x48] sm:$0xff]  ;;  %134 = vmatpush.msra.mxu2 %v54_v7  ;;  %v48_v15 = vld [vmem:[#allocation3 + $0x20] sm:$0xff]  ;;  %v46_v16 = vld [vmem:[#allocation3 + $0x10] sm:$0xff] }
   0xc   :  { %154 = vmatpush.msra.mxu3 %v55_v8  ;;  %94 = vmatpush.msra.mxu0 %v52_v13  ;;  %v47_v17 = vld [vmem:[#allocation3 + $0x18] sm:$0xff]  ;;  %v49_v18 = vld [vmem:[#allocation3 + $0x28] sm:$0xff]  ;;  %v43_v19 = vld [vmem:[%s323_s1] sm:$0xff]  ;;  %s289_s1 = smov [#allocation6]  }
   0xd   :  { %114 = vmatpush.msra.mxu1 %v53_v14  ;;  %135 = vmatpush.msra.mxu2 %v50_v11  ;;  %v44_v20 = vld [vmem:[#allocation3] sm:$0xff]  ;;  %v45_v21 = vld [vmem:[#allocation3 + $0x8] sm:$0xff] }
   0xe   :  { %155 = vmatpush.msra.mxu3 %v51_v12  ;;  %95 = vmatpush.msra.mxu0 %v48_v15  ;;  %v176_v22 = vld [vmem:[%s324_s2] sm:$0xff]  ;;  %s207_s2 = sshll.u32 %s289_s1, 4  ;;  %s208_s2 = int_to_ptr.vmem [resolvable:$true] %s207_s2 }
   0xf   :  { %115 = vmatpush.msra.mxu1 %v49_v18  ;;  %136 = vmatpush.msra.mxu2 %v46_v16 }
  0x10   :  { %156 = vmatpush.msra.mxu3 %v47_v17  ;;  %224 = vmatmul.msk.f32.vlgmr.msra.gmra.mxu2 %vm64_vm1, %v43_v19 }
  0x11   :  { %226 = vmatmul.msk.f32.vlgmr.msra.gmra.mxu3 %vm64_vm1, %v43_v19  ;;  %96 = vmatpush.msra.mxu0 %v44_v20 }
  0x12   :  { %116 = vmatpush.msra.mxu1 %v45_v21  ;;  %220 = vmatmul.msk.f32.vlgmr.msra.gmra.mxu0 %vm64_vm1, %v43_v19 }
  0x13   :  { %222 = vmatmul.msk.f32.vlgmr.msra.gmra.mxu1 %vm64_vm1, %v43_v19  ;;  %179 = vperm.xlu0 %232, %v176_v22  }
  0x85   :  { %v180_v23 = vpop.permute.xlu0 %179 }
  0x8f   :  { %v98_v24 = vpop.f32.mrf.mxu0 }
  0x90   :  { %v118_v25 = vpop.f32.mrf.mxu1  ;;  %v182_v26 = vadd.f32 %v180_v23, %v98_v24 }
  0x91   :  { %v183_v27 = vadd.f32 %v180_v23, %v118_v25 }
  0x92   :  { %vm186_vm2 = vcmp.ge.f32.partialorder %v182_v26, 0.0  ;;  %v190_v28 = vmul.f32 0.01, %v182_v26 }
  0x93   :  { %vm187_vm3 = vcmp.ge.f32.partialorder %v183_v27, 0.0  ;;  %v191_v29 = vmul.f32 0.01, %v183_v27  ;;  %v138_v30 = vpop.f32.mrf.mxu2 }
  0x94   :  { %v158_v31 = vpop.f32.mrf.mxu3  ;;  %v194_v32 = vsel %vm186_vm2, %v182_v26, %v190_v28  ;;  %v184_v34 = vadd.f32 %v180_v23, %v138_v30 }
  0x95   :  { %v195_v33 = vsel %vm187_vm3, %v183_v27, %v191_v29  ;;  %v185_v35 = vadd.f32 %v180_v23, %v158_v31  ;;  %198 = vst [vmem:[#allocation6] sm:$0xff] %v194_v32 }
  0x96   :  { %199 = vst [vmem:[#allocation6 + $0x8] sm:$0xff] %v195_v33  ;;  %vm188_vm4 = vcmp.ge.f32.partialorder %v184_v34, 0.0  ;;  %v192_v36 = vmul.f32 0.01, %v184_v34 }
  0x97   :  { %vm189_vm5 = vcmp.ge.f32.partialorder %v185_v35, 0.0  ;;  %v193_v37 = vmul.f32 0.01, %v185_v35 }
  0x98   :  { %v196_v38 = vsel %vm188_vm4, %v184_v34, %v192_v36 }
  0x99   :  { %200 = vst [vmem:[#allocation6 + $0x10] sm:$0xff] %v196_v38  ;;  %v197_v39 = vsel %vm189_vm5, %v185_v35, %v193_v37 }
  0x9a   :  { %201 = vst [vmem:[#allocation6 + $0x18] sm:$0xff] %v197_v39 }
  0x9b   :  { %212 = dma.vmem_to_hbm [thread:$0]  %s208_s2, 512, %s210_s24, [#allocation5]  }
  0x9c   :  { %283 = dma.done.wait [#allocation5], 512  }
  0x9d   :  { %284 = vsyncadd [#allocation5], 4294966784 }
  0x9e   :  { %217 = vsyncpa [#allocation4], 1 }
  0x9f   :  { %218 = vsyncpa [#allocation5], 1 }

</bundles_post_ra>
